<compile_context>
chip_gen: v6e
topology: v6e:2x2x1
jax: 0.10.0
libtpu: 0.0.40
codegen_flags: <defaults>
</compile_context>

<pallas_src>
import jax
import jax.numpy as jnp
from jax import lax
from jax.experimental import pallas as pl
from jax.experimental.pallas import tpu as pltpu


def _matmul_bias_kernel(lhs_ref, rhs_ref, b_ref, o_ref):
    # o = lhs @ rhs + b   (canonical MXU contraction: dim 1 of LHS with dim 0 of RHS)
    acc = lax.dot_general(
        lhs_ref[...],
        rhs_ref[...],
        dimension_numbers=(((1,), (0,)), ((), ())),
        preferred_element_type=jnp.float32,
    )
    o_ref[...] = (acc + b_ref[...]).astype(o_ref.dtype)


def _matmul_bias(lhs, rhs, bias2d, out_dtype):
    m, k = lhs.shape
    _, n = rhs.shape
    vmem = pl.BlockSpec(memory_space=pltpu.MemorySpace.VMEM)
    cost = pl.CostEstimate(
        flops=2 * m * k * n,
        transcendentals=0,
        bytes_accessed=4 * (m * k + k * n + m * n + bias2d.size),
    )
    return pl.pallas_call(
        _matmul_bias_kernel,
        out_shape=jax.ShapeDtypeStruct((m, n), out_dtype),
        in_specs=[vmem, vmem, vmem],
        out_specs=vmem,
        cost_estimate=cost,
    )(lhs, rhs, bias2d)


def init_conv1x1_params(weight, bias):
    """One-time parameter prep (amortized to zero): both weight layouts."""
    cout, cin = weight.shape[0], weight.shape[1]
    w_oi = weight.reshape(cout, cin)          # (Cout, Cin)  -- used as LHS in the N==1 spatial path
    w_io = jnp.transpose(w_oi)                # (Cin, Cout)  -- used as RHS in the row-major path
    return {"w_oi": w_oi, "w_io": w_io, "bias": bias, "cin": cin, "cout": cout}


def conv2d_1x1(x_nchw, params):
    """1x1 stride-1 Conv2d, NCHW semantics."""
    n, cin, h, w = x_nchw.shape
    cout = params["cout"]
    hw = h * w
    bias = params["bias"]

    if hw == 1:
        # The module's actual case: pure channel matmul, reshape only (no transposes).
        lhs = x_nchw.reshape(n, cin)                                   # (N, Cin)
        out2d = _matmul_bias(lhs, params["w_io"], bias.reshape(1, cout), x_nchw.dtype)
        return out2d.reshape(n, cout, 1, 1)

    if n == 1:
        # Transpose-free general spatial path: (Cout,Cin) @ (Cin, H*W) -> (Cout, H*W).
        rhs = x_nchw.reshape(cin, hw)
        out2d = _matmul_bias(params["w_oi"], rhs, bias.reshape(cout, 1), x_nchw.dtype)
        return out2d.reshape(1, cout, h, w)

    # Generic batched fallback: fold N,H,W into rows (one transpose each side).
    # TODO(synk): when N*H*W grows large, tile M on a "parallel" grid axis and keep
    # the weight resident (index_map ignoring the M index); TM<=2048 fp32 rows on v7x.
    lhs = jnp.transpose(x_nchw, (0, 2, 3, 1)).reshape(n * hw, cin)
    out2d = _matmul_bias(lhs, params["w_io"], bias.reshape(1, cout), x_nchw.dtype)
    return jnp.transpose(out2d.reshape(n, h, w, cout), (0, 3, 1, 2))


if __name__ == "__main__":
    key = jax.random.PRNGKey(0)
    k_x, k_w, k_b, k_x2 = jax.random.split(key, 4)

    N, CIN, COUT = 1, 1200, 50  # Conv2d(1200, 50, kernel_size=1) on [1, 1200, 1, 1]

    x = jax.random.normal(k_x, (N, CIN, 1, 1), dtype=jnp.float32)
    weight = jax.random.normal(k_w, (COUT, CIN, 1, 1), dtype=jnp.float32) * 0.02
    bias = jax.random.normal(k_b, (COUT,), dtype=jnp.float32) * 0.02

    params = init_conv1x1_params(weight, bias)

    out = jax.block_until_ready(conv2d_1x1(x, params))
    assert out.shape == (N, COUT, 1, 1)

    ref = jnp.dot(
        x.reshape(N, CIN), weight.reshape(COUT, CIN).T,
        precision=lax.Precision.HIGHEST,
    ) + bias
    ref = ref.reshape(N, COUT, 1, 1)
    assert jnp.allclose(out, ref, atol=1e-4, rtol=1e-4)

    # Secondary check: the transpose-free H*W>1 path (small spatial extent).
    x2 = jax.random.normal(k_x2, (1, CIN, 2, 2), dtype=jnp.float32)
    out2 = jax.block_until_ready(conv2d_1x1(x2, params))
    ref2 = jnp.einsum(
        "oc,nchw->nohw", weight.reshape(COUT, CIN), x2,
        precision=lax.Precision.HIGHEST,
    ) + bias.reshape(1, COUT, 1, 1)
    assert jnp.allclose(out2, ref2, atol=1e-4, rtol=1e-4)

    print("KERNEL_OK")
</pallas_src>

<mosaic_0001>
module attributes {stable_mosaic.version = 11 : i64} {
  func.func @_matmul_bias_kernel(%arg0: memref<1x1200xf32, #tpu.memory_space<vmem>>, %arg1: memref<1200x50xf32, #tpu.memory_space<vmem>>, %arg2: memref<1x50xf32, #tpu.memory_space<vmem>>, %arg3: memref<1x50xf32, #tpu.memory_space<vmem>>) attributes {dimension_semantics = [], scalar_prefetch = 0 : i64, scratch_operands = 0 : i64, tpu.core_type = #tpu.core_type<tc>} {
    %c0 = arith.constant 0 : index
    %c0_0 = arith.constant 0 : index
    %0 = vector.load %arg0[%c0, %c0_0] : memref<1x1200xf32, #tpu.memory_space<vmem>>, vector<1x1200xf32>
    %c0_1 = arith.constant 0 : index
    %c0_2 = arith.constant 0 : index
    %1 = vector.load %arg1[%c0_1, %c0_2] : memref<1200x50xf32, #tpu.memory_space<vmem>>, vector<1200x50xf32>
    %cst = arith.constant dense<0.000000e+00> : vector<1x50xf32>
    %2 = tpu.matmul %0, %1, %cst {dimension_numbers = #tpu.dot_dimension_numbers<[1], [0], [0], [1], [0, 0, 1, 1], [], []>} : vector<1x1200xf32>, vector<1200x50xf32>, vector<1x50xf32> -> vector<1x50xf32>
    %c0_3 = arith.constant 0 : index
    %c0_4 = arith.constant 0 : index
    %3 = vector.load %arg2[%c0_3, %c0_4] : memref<1x50xf32, #tpu.memory_space<vmem>>, vector<1x50xf32>
    %4 = arith.addf %2, %3 : vector<1x50xf32>
    %c0_5 = arith.constant 0 : index
    %c0_6 = arith.constant 0 : index
    %5 = vector.load %arg3[%c0_5, %c0_6] : memref<1x50xf32, #tpu.memory_space<vmem>>, vector<1x50xf32>
    tpu.vector_store %arg3[%c0_5, %c0_6], %4 {strides = array<i32>} : memref<1x50xf32, #tpu.memory_space<vmem>>, vector<1x50xf32>,
    return
  }
}

</mosaic_0001>

<bundles_post_ra>
// kernel: tpu_custom_call.1
= control target key start
LH: loop header
LB: loop body
LE: loop exit
PB: predicated region body
PF: predicated region fallthrough
CT: control target
= control target key end

     0   :  { %v170_v5 = vlaneseq  ;;  %s1293_s0 = inlined_call_operand.vmem [shape: f32[1,1200], index: 0, kind: input, shape index: {}]   ;;  %s1294_s1 = inlined_call_operand.vmem [shape: f32[1200,50], index: 1, kind: input, shape index: {}]   ;;  %s1295_s2 = inlined_call_operand.vmem [shape: f32[1,50], index: 2, kind: input, shape index: {}]   ;;  %s1296_s3 = inlined_call_operand.hbm [shape: f32[1,50], index: 3, kind: output, shape index: {}]  }
   0x1   :  { %v48_v0 = vld [vmem:[%s1294_s1 + $0xf8] sm:$0xff]  ;;  %v47_v2 = vld [vmem:[%s1294_s1 + $0xf0] sm:$0xff]  ;;  %v46_v4 = vld [vmem:[%s1294_s1 + $0xe8] sm:$0xff] }
   0x2   :  { %v32_v1 = vld [vmem:[%s1294_s1 + $0x78] sm:$0xff]  ;;  %589 = vmatprep.subr.mxu1 %v48_v0  ;;  %v31_v3 = vld [vmem:[%s1294_s1 + $0x70] sm:$0xff]  ;;  %v30_v6 = vld [vmem:[%s1294_s1 + $0x68] sm:$0xff]  ;;  %v802_v10 = vshrl.u32 %v170_v5, 7 }
   0x3   :  { %590 = vmatpush3.msra.mxu1 %v32_v1  ;;  %v45_v7 = vld [vmem:[%s1294_s1 + $0xe0] sm:$0xff]  ;;  %v44_v9 = vld [vmem:[%s1294_s1 + $0xd8] sm:$0xff]  ;;  %v43_v12 = vld [vmem:[%s1294_s1 + $0xd0] sm:$0xff] }
   0x4   :  { %591 = vmatprep.subr.mxu1 %v47_v2  ;;  %v29_v8 = vld [vmem:[%s1294_s1 + $0x60] sm:$0xff]  ;;  %v28_v11 = vld [vmem:[%s1294_s1 + $0x58] sm:$0xff]  ;;  %v27_v14 = vld [vmem:[%s1294_s1 + $0x50] sm:$0xff]  ;;  %v176_v19 = vsub.s32 1, %v802_v10  ;;  %v200_v25 = vsub.s32 7, %v802_v10  ;;  %v196_v28 = vsub.s32 6, %v802_v10 }
   0x5   :  { %592 = vmatpush3.msra.mxu1 %v31_v3  ;;  %v112_v13 = vld [vmem:[%s1294_s1 + $0x2f8] sm:$0xff]  ;;  %v111_v16 = vld [vmem:[%s1294_s1 + $0x2f0] sm:$0xff]  ;;  %v42_v17 = vld [vmem:[%s1294_s1 + $0xc8] sm:$0xff]  ;;  %v172_v55 = vsub.s32 0, %v802_v10 }
   0x6   :  { %593 = vmatprep.subr.mxu1 %v46_v4  ;;  %659 = vmatprep.subr.mxu0 %v112_v13  ;;  %v96_v15 = vld [vmem:[%s1294_s1 + $0x278] sm:$0xff]  ;;  %v95_v18 = vld [vmem:[%s1294_s1 + $0x270] sm:$0xff]  ;;  %v26_v20 = vld [vmem:[%s1294_s1 + $0x48] sm:$0xff] }
   0x7   :  { %594 = vmatpush3.msra.mxu1 %v30_v6  ;;  %660 = vmatpush3.msra.mxu0 %v96_v15  ;;  %v110_v21 = vld [vmem:[%s1294_s1 + $0x2e8] sm:$0xff]  ;;  %v41_v23 = vld [vmem:[%s1294_s1 + $0xc0] sm:$0xff]  ;;  %v40_v29 = vld [vmem:[%s1294_s1 + $0xb8] sm:$0xff] }
   0x8   :  { %595 = vmatprep.subr.mxu1 %v45_v7  ;;  %661 = vmatprep.subr.mxu0 %v111_v16  ;;  %v94_v22 = vld [vmem:[%s1294_s1 + $0x268] sm:$0xff]  ;;  %v109_v24 = vld [vmem:[%s1294_s1 + $0x2e0] sm:$0xff]  ;;  %v24_v32 = vld [vmem:[%s1294_s1 + $0x38] sm:$0xff] }
   0x9   :  { %596 = vmatpush3.msra.mxu1 %v29_v8  ;;  %662 = vmatpush3.msra.mxu0 %v95_v18  ;;  %v25_v26 = vld [vmem:[%s1294_s1 + $0x40] sm:$0xff]  ;;  %v108_v33 = vld [vmem:[%s1294_s1 + $0x2d8] sm:$0xff]  ;;  %v39_v34 = vld [vmem:[%s1294_s1 + $0xb0] sm:$0xff] }
   0xa   :  { %597 = vmatprep.subr.mxu1 %v44_v9  ;;  %663 = vmatprep.subr.mxu0 %v110_v21  ;;  %v851_v27 = vld [vmem:[%s1293_s0] sm:$0xff]  ;;  %v92_v35 = vld [vmem:[%s1294_s1 + $0x258] sm:$0xff]  ;;  %v23_v37 = vld [vmem:[%s1294_s1 + $0x30] sm:$0xff] }
   0xb   :  { %598 = vmatpush3.msra.mxu1 %v28_v11  ;;  %664 = vmatpush3.msra.mxu0 %v94_v22  ;;  %v177_v30 = vrot.slane %v851_v27, %v176_v19  ;;  %v93_v31 = vld [vmem:[%s1294_s1 + $0x260] sm:$0xff]  ;;  %v876_v36 = vrot.slane %v851_v27, %v200_v25  ;;  %v107_v38 = vld [vmem:[%s1294_s1 + $0x2d0] sm:$0xff]  ;;  %v885_v39 = vrot.slane %v851_v27, %v196_v28  ;;  %v38_v40 = vld [vmem:[%s1294_s1 + $0xa8] sm:$0xff] }
   0xc   :  { %599 = vmatprep.subr.mxu1 %v43_v12  ;;  %665 = vmatprep.subr.mxu0 %v109_v24  ;;  %v91_v41 = vld [vmem:[%s1294_s1 + $0x250] sm:$0xff]  ;;  %v22_v42 = vld [vmem:[%s1294_s1 + $0x28] sm:$0xff]  ;;  %v37_v44 = vld [vmem:[%s1294_s1 + $0xa0] sm:$0xff]  ;;  %v173_v0 = vrot.slane %v851_v27, %v172_v55 }
   0xd   :  { %600 = vmatpush3.msra.mxu1 %v27_v14  ;;  %286 = vmatprep.mubr.f32.mxu1 %v177_v30  ;;  %v106_v43 = vld [vmem:[%s1294_s1 + $0x2c8] sm:$0xff]  ;;  %v21_v46 = vld [vmem:[%s1294_s1 + $0x20] sm:$0xff]  ;;  %v36_v48 = vld [vmem:[%s1294_s1 + $0x98] sm:$0xff]  ;;  %v192_v14 = vsub.s32 5, %v802_v10 }
   0xe   :  { %601 = vmatprep.subr.mxu1 %v42_v17  ;;  %666 = vmatpush3.msra.mxu0 %v93_v31  ;;  %v90_v45 = vld [vmem:[%s1294_s1 + $0x248] sm:$0xff]  ;;  %v105_v47 = vld [vmem:[%s1294_s1 + $0x2c0] sm:$0xff]  ;;  %v20_v50 = vld [vmem:[%s1294_s1 + $0x18] sm:$0xff] }
   0xf   :  { %602 = vmatpush3.msra.mxu1 %v26_v20  ;;  %667 = vmatprep.subr.mxu0 %v108_v33  ;;  %v89_v49 = vld [vmem:[%s1294_s1 + $0x240] sm:$0xff]  ;;  %v104_v51 = vld [vmem:[%s1294_s1 + $0x2b8] sm:$0xff]  ;;  %v35_v52 = vld [vmem:[%s1294_s1 + $0x90] sm:$0xff]  ;;  %v188_v20 = vsub.s32 4, %v802_v10  ;;  %v193_v25 = vrot.slane %v851_v27, %v192_v14 }
  0x10   :  { %603 = vmatprep.subr.mxu1 %v41_v23  ;;  %668 = vmatpush3.msra.mxu0 %v92_v35  ;;  %v88_v53 = vld [vmem:[%s1294_s1 + $0x238] sm:$0xff]  ;;  %v19_v54 = vld [vmem:[%s1294_s1 + $0x10] sm:$0xff]  ;;  %v34_v57 = vld [vmem:[%s1294_s1 + $0x88] sm:$0xff]  ;;  %v184_v35 = vsub.s32 3, %v802_v10 }
  0x11   :  { %604 = vmatpush3.msra.mxu1 %v25_v26  ;;  %669 = vmatprep.subr.mxu0 %v107_v38  ;;  %v103_v56 = vld [vmem:[%s1294_s1 + $0x2b0] sm:$0xff]  ;;  %v18_v59 = vld [vmem:[%s1294_s1 + $0x8] sm:$0xff]  ;;  %v33_v61 = vld [vmem:[%s1294_s1 + $0x80] sm:$0xff] }
  0x12   :  { %605 = vmatprep.subr.mxu1 %v40_v29  ;;  %670 = vmatpush3.msra.mxu0 %v91_v41  ;;  %v87_v58 = vld [vmem:[%s1294_s1 + $0x230] sm:$0xff]  ;;  %v102_v60 = vld [vmem:[%s1294_s1 + $0x2a8] sm:$0xff]  ;;  %v17_v63 = vld [vmem:[%s1294_s1] sm:$0xff]  ;;  %v189_v29 = vrot.slane %v851_v27, %v188_v20 }
  0x13   :  { %606 = vmatpush3.msra.mxu1 %v24_v32  ;;  %671 = vmatprep.subr.mxu0 %v106_v43  ;;  %v86_v62 = vld [vmem:[%s1294_s1 + $0x228] sm:$0xff]  ;;  %v101_v1 = vld [vmem:[%s1294_s1 + $0x2a0] sm:$0xff]  ;;  %v80_v2 = vld [vmem:[%s1294_s1 + $0x1f8] sm:$0xff] }
  0x14   :  { %607 = vmatprep.subr.mxu1 %v39_v34  ;;  %672 = vmatpush3.msra.mxu0 %v90_v45  ;;  %v64_v3 = vld [vmem:[%s1294_s1 + $0x178] sm:$0xff]  ;;  %v85_v4 = vld [vmem:[%s1294_s1 + $0x220] sm:$0xff]  ;;  %v79_v5 = vld [vmem:[%s1294_s1 + $0x1f0] sm:$0xff]  ;;  %v753_v34 = vmov 0.0  }
  0x15   :  { %608 = vmatpush3.msra.mxu1 %v23_v37  ;;  %673 = vmatprep.subr.mxu0 %v105_v47  ;;  %v100_v6 = vld [vmem:[%s1294_s1 + $0x298] sm:$0xff]  ;;  %v63_v7 = vld [vmem:[%s1294_s1 + $0x170] sm:$0xff]  ;;  %v78_v9 = vld [vmem:[%s1294_s1 + $0x1e8] sm:$0xff] }
  0x16   :  { %609 = vmatprep.subr.mxu1 %v38_v40  ;;  %674 = vmatpush3.msra.mxu0 %v89_v49  ;;  %v84_v8 = vld [vmem:[%s1294_s1 + $0x218] sm:$0xff]  ;;  %v99_v11 = vld [vmem:[%s1294_s1 + $0x290] sm:$0xff]  ;;  %v62_v12 = vld [vmem:[%s1294_s1 + $0x168] sm:$0xff] }
  0x17   :  { %610 = vmatpush3.msra.mxu1 %v22_v42  ;;  %675 = vmatprep.subr.mxu0 %v104_v51  ;;  %v83_v13 = vld [vmem:[%s1294_s1 + $0x210] sm:$0xff]  ;;  %v77_v15 = vld [vmem:[%s1294_s1 + $0x1e0] sm:$0xff]  ;;  %v98_v16 = vld [vmem:[%s1294_s1 + $0x288] sm:$0xff] }
  0x18   :  { %611 = vmatprep.subr.mxu1 %v37_v44  ;;  %676 = vmatpush3.msra.mxu0 %v88_v53  ;;  %v61_v17 = vld [vmem:[%s1294_s1 + $0x160] sm:$0xff]  ;;  %v82_v18 = vld [vmem:[%s1294_s1 + $0x208] sm:$0xff]  ;;  %v76_v21 = vld [vmem:[%s1294_s1 + $0x1d8] sm:$0xff]  ;;  %v185_v44 = vrot.slane %v851_v27, %v184_v35 }
  0x19   :  { %612 = vmatpush3.msra.mxu1 %v21_v46  ;;  %677 = vmatprep.subr.mxu0 %v103_v56  ;;  %v97_v22 = vld [vmem:[%s1294_s1 + $0x280] sm:$0xff]  ;;  %v60_v23 = vld [vmem:[%s1294_s1 + $0x158] sm:$0xff]  ;;  %v75_v26 = vld [vmem:[%s1294_s1 + $0x1d0] sm:$0xff] }
  0x1a   :  { %613 = vmatprep.subr.mxu1 %v36_v48  ;;  %678 = vmatpush3.msra.mxu0 %v87_v58  ;;  %v81_v24 = vld [vmem:[%s1294_s1 + $0x200] sm:$0xff]  ;;  %v59_v28 = vld [vmem:[%s1294_s1 + $0x150] sm:$0xff]  ;;  %v74_v30 = vld [vmem:[%s1294_s1 + $0x1c8] sm:$0xff] }
  0x1b   :  { %614 = vmatpush3.msra.mxu1 %v20_v50  ;;  %679 = vmatprep.subr.mxu0 %v102_v60  ;;  %v58_v31 = vld [vmem:[%s1294_s1 + $0x148] sm:$0xff]  ;;  %v160_v32 = vld [vmem:[%s1294_s1 + $0x478] sm:$0xff]  ;;  %v73_v33 = vld [vmem:[%s1294_s1 + $0x1c0] sm:$0xff] }
  0x1c   :  { %615 = vmatprep.subr.mxu1 %v35_v52  ;;  %680 = vmatpush3.msra.mxu0 %v86_v62  ;;  %v57_v37 = vld [vmem:[%s1294_s1 + $0x140] sm:$0xff]  ;;  %v159_v38 = vld [vmem:[%s1294_s1 + $0x470] sm:$0xff]  ;;  %v72_v40 = vld [vmem:[%s1294_s1 + $0x1b8] sm:$0xff] }
  0x1d   :  { %616 = vmatpush3.msra.mxu1 %v19_v54  ;;  %681 = vmatprep.subr.mxu0 %v101_v1  ;;  %v56_v41 = vld [vmem:[%s1294_s1 + $0x138] sm:$0xff]  ;;  %v158_v42 = vld [vmem:[%s1294_s1 + $0x468] sm:$0xff]  ;;  %v71_v43 = vld [vmem:[%s1294_s1 + $0x1b0] sm:$0xff] }
  0x1e   :  { %617 = vmatprep.subr.mxu1 %v34_v57  ;;  %682 = vmatpush3.msra.mxu0 %v85_v4  ;;  %v55_v45 = vld [vmem:[%s1294_s1 + $0x130] sm:$0xff]  ;;  %v70_v46 = vld [vmem:[%s1294_s1 + $0x1a8] sm:$0xff]  ;;  %v157_v47 = vld [vmem:[%s1294_s1 + $0x460] sm:$0xff] }
  0x1f   :  { %618 = vmatpush3.msra.mxu1 %v18_v59  ;;  %683 = vmatprep.subr.mxu0 %v100_v6 }
  0x20   :  { %619 = vmatprep.subr.mxu1 %v33_v61  ;;  %684 = vmatpush3.msra.mxu0 %v84_v8 }
  0x21   :  { %620 = vmatpush3.msra.mxu1 %v17_v63  ;;  %685 = vmatprep.subr.mxu0 %v99_v11 }
  0x22   :  { %287 = vmatmul.mubr.f32.vlgmr.msra.gmra.mxu1 %v173_v0  ;;  %624 = vmatprep.subr.mxu1 %v80_v2 }
  0x23   :  { %625 = vmatpush3.msra.mxu1 %v64_v3  ;;  %686 = vmatpush3.msra.mxu0 %v83_v13 }
  0x24   :  { %626 = vmatprep.subr.mxu1 %v79_v5  ;;  %687 = vmatprep.subr.mxu0 %v98_v16 }
  0x25   :  { %627 = vmatpush3.msra.mxu1 %v63_v7  ;;  %688 = vmatpush3.msra.mxu0 %v82_v18 }
  0x26   :  { %628 = vmatprep.subr.mxu1 %v78_v9  ;;  %689 = vmatprep.subr.mxu0 %v97_v22 }
  0x27   :  { %629 = vmatpush3.msra.mxu1 %v62_v12  ;;  %690 = vmatpush3.msra.mxu0 %v81_v24 }
  0x28   :  { %630 = vmatprep.subr.mxu1 %v77_v15  ;;  %426 = vmatprep.mubr.f32.mxu0 %v193_v25 }
  0x29   :  { %631 = vmatpush3.msra.mxu1 %v61_v17  ;;  %502 = vmatprep.subr.mxu0 %v753_v34 }
  0x2a   :  { %632 = vmatprep.subr.mxu1 %v76_v21  ;;  %427 = vmatmul.mubr.f32.vlgmr.msra.gmra.mxu0 %v189_v29 }
  0x2b   :  { %633 = vmatpush3.msra.mxu1 %v60_v23  ;;  %503 = vmatpush1.msra.mxu0 %v160_v32 }
  0x2c   :  { %634 = vmatprep.subr.mxu1 %v75_v26  ;;  %504 = vmatprep.subr.mxu0 %v753_v34 }
  0x2d   :  { %635 = vmatpush3.msra.mxu1 %v59_v28  ;;  %505 = vmatpush1.msra.mxu0 %v159_v38 }
  0x2e   :  { %636 = vmatprep.subr.mxu1 %v74_v30  ;;  %506 = vmatprep.subr.mxu0 %v753_v34 }
  0x2f   :  { %637 = vmatpush3.msra.mxu1 %v58_v31  ;;  %507 = vmatpush1.msra.mxu0 %v158_v42 }
  0x30   :  { %638 = vmatprep.subr.mxu1 %v73_v33 }
  0x31   :  { %639 = vmatpush3.msra.mxu1 %v57_v37 }
  0x32   :  { %640 = vmatprep.subr.mxu1 %v72_v40 }
  0x33   :  { %641 = vmatpush3.msra.mxu1 %v56_v41 }
  0x34   :  { %8 = vsyncpa [#allocation3], 0  ;;  %642 = vmatprep.subr.mxu1 %v71_v43  ;;  %v54_v48 = vld [vmem:[%s1294_s1 + $0x128] sm:$0xff]  ;;  %508 = vmatprep.subr.mxu0 %v753_v34  ;;  %v69_v49 = vld [vmem:[%s1294_s1 + $0x1a0] sm:$0xff]  ;;  %v180_v59 = vsub.s32 2, %v802_v10  ;;  %vm219_vm0 = vcmask 392192  }
  0x35   :  { %643 = vmatpush3.msra.mxu1 %v55_v45  ;;  %356 = vmatprep.mubr.f32.mxu1 %v185_v44  ;;  %v156_v50 = vld [vmem:[%s1294_s1 + $0x458] sm:$0xff]  ;;  %v53_v51 = vld [vmem:[%s1294_s1 + $0x120] sm:$0xff]  ;;  %v155_v53 = vld [vmem:[%s1294_s1 + $0x450] sm:$0xff]  ;;  %vm572_vm1 = vcmask 401408  }
  0x36   :  { %644 = vmatprep.subr.mxu1 %v70_v46  ;;  %509 = vmatpush1.msra.mxu0 %v157_v47  ;;  %v68_v52 = vld [vmem:[%s1294_s1 + $0x198] sm:$0xff]  ;;  %v67_v56 = vld [vmem:[%s1294_s1 + $0x190] sm:$0xff]  ;;  %v154_v57 = vld [vmem:[%s1294_s1 + $0x448] sm:$0xff]  ;;  %v181_v2 = vrot.slane %v851_v27, %v180_v59 }
  0x37   :  { %645 = vmatpush3.msra.mxu1 %v54_v48  ;;  %510 = vmatprep.subr.mxu0 %v753_v34  ;;  %v52_v54 = vld [vmem:[%s1294_s1 + $0x118] sm:$0xff]  ;;  %v51_v58 = vld [vmem:[%s1294_s1 + $0x110] sm:$0xff]  ;;  %v66_v60 = vld [vmem:[%s1294_s1 + $0x188] sm:$0xff] }
  0x38   :  { %646 = vmatprep.subr.mxu1 %v69_v49  ;;  %511 = vmatpush1.msra.mxu0 %v156_v50  ;;  %v153_v61 = vld [vmem:[%s1294_s1 + $0x440] sm:$0xff]  ;;  %v50_v62 = vld [vmem:[%s1294_s1 + $0x108] sm:$0xff]  ;;  %v152_v0 = vld [vmem:[%s1294_s1 + $0x438] sm:$0xff] }
  0x39   :  { %647 = vmatpush3.msra.mxu1 %v53_v51  ;;  %512 = vmatprep.subr.mxu0 %v753_v34  ;;  %v65_v63 = vld [vmem:[%s1294_s1 + $0x180] sm:$0xff]  ;;  %v144_v3 = vld [vmem:[%s1294_s1 + $0x3f8] sm:$0xff]  ;;  %v151_v5 = vld [vmem:[%s1294_s1 + $0x430] sm:$0xff] }
  0x3a   :  { %648 = vmatprep.subr.mxu1 %v68_v52  ;;  %513 = vmatpush1.msra.mxu0 %v155_v53  ;;  %v49_v1 = vld [vmem:[%s1294_s1 + $0x100] sm:$0xff]  ;;  %v128_v4 = vld [vmem:[%s1294_s1 + $0x378] sm:$0xff]  ;;  %v143_v27 = vld [vmem:[%s1294_s1 + $0x3f0] sm:$0xff] }
  0x3b   :  { %649 = vmatpush3.msra.mxu1 %v52_v54  ;;  %514 = vmatprep.subr.mxu0 %v753_v34  ;;  %v127_v6 = vld [vmem:[%s1294_s1 + $0x370] sm:$0xff]  ;;  %v150_v7 = vld [vmem:[%s1294_s1 + $0x428] sm:$0xff]  ;;  %v149_v11 = vld [vmem:[%s1294_s1 + $0x420] sm:$0xff] }
  0x3c   :  { %650 = vmatprep.subr.mxu1 %v67_v56  ;;  %515 = vmatpush1.msra.mxu0 %v154_v57  ;;  %v142_v8 = vld [vmem:[%s1294_s1 + $0x3e8] sm:$0xff]  ;;  %v141_v12 = vld [vmem:[%s1294_s1 + $0x3e0] sm:$0xff]  ;;  %v148_v14 = vld [vmem:[%s1294_s1 + $0x418] sm:$0xff] }
  0x3d   :  { %651 = vmatpush3.msra.mxu1 %v51_v58  ;;  %516 = vmatprep.subr.mxu0 %v753_v34  ;;  %v126_v9 = vld [vmem:[%s1294_s1 + $0x368] sm:$0xff]  ;;  %v125_v13 = vld [vmem:[%s1294_s1 + $0x360] sm:$0xff]  ;;  %v140_v15 = vld [vmem:[%s1294_s1 + $0x3d8] sm:$0xff] }
  0x3e   :  { %652 = vmatprep.subr.mxu1 %v66_v60  ;;  %517 = vmatpush1.msra.mxu0 %v153_v61  ;;  %v124_v16 = vld [vmem:[%s1294_s1 + $0x358] sm:$0xff]  ;;  %v147_v17 = vld [vmem:[%s1294_s1 + $0x410] sm:$0xff]  ;;  %v146_v21 = vld [vmem:[%s1294_s1 + $0x408] sm:$0xff] }
  0x3f   :  { %653 = vmatpush3.msra.mxu1 %v50_v62  ;;  %518 = vmatprep.subr.mxu0 %v753_v34  ;;  %v139_v18 = vld [vmem:[%s1294_s1 + $0x3d0] sm:$0xff]  ;;  %v138_v22 = vld [vmem:[%s1294_s1 + $0x3c8] sm:$0xff]  ;;  %v145_v24 = vld [vmem:[%s1294_s1 + $0x400] sm:$0xff] }
  0x40   :  { %654 = vmatprep.subr.mxu1 %v65_v63  ;;  %519 = vmatpush1.msra.mxu0 %v152_v0  ;;  %v123_v20 = vld [vmem:[%s1294_s1 + $0x350] sm:$0xff]  ;;  %v122_v23 = vld [vmem:[%s1294_s1 + $0x348] sm:$0xff]  ;;  %v137_v25 = vld [vmem:[%s1294_s1 + $0x3c0] sm:$0xff] }
  0x41   :  { %655 = vmatpush3.msra.mxu1 %v49_v1  ;;  %520 = vmatprep.subr.mxu0 %v753_v34  ;;  %v121_v26 = vld [vmem:[%s1294_s1 + $0x340] sm:$0xff]  ;;  %v166_v28 = vld [vmem:[%s1294_s1 + $0x4a8] sm:$0xff]  ;;  %v136_v29 = vld [vmem:[%s1294_s1 + $0x3b8] sm:$0xff] }
  0x42   :  { %357 = vmatmul.mubr.f32.vlgmr.msra.gmra.mxu1 %v181_v2  ;;  %694 = vmatprep.subr.mxu1 %v144_v3  ;;  %v120_v30 = vld [vmem:[%s1294_s1 + $0x338] sm:$0xff]  ;;  %v165_v31 = vld [vmem:[%s1294_s1 + $0x4a0] sm:$0xff]  ;;  %v135_v32 = vld [vmem:[%s1294_s1 + $0x3b0] sm:$0xff] }
  0x43   :  { %695 = vmatpush3.msra.mxu1 %v128_v4  ;;  %521 = vmatpush1.msra.mxu0 %v151_v5  ;;  %v119_v33 = vld [vmem:[%s1294_s1 + $0x330] sm:$0xff]  ;;  %v164_v35 = vld [vmem:[%s1294_s1 + $0x498] sm:$0xff]  ;;  %v134_v37 = vld [vmem:[%s1294_s1 + $0x3a8] sm:$0xff] }
  0x44   :  { %696 = vmatprep.subr.mxu1 %v143_v27  ;;  %522 = vmatprep.subr.mxu0 %v753_v34  ;;  %v118_v38 = vld [vmem:[%s1294_s1 + $0x328] sm:$0xff]  ;;  %v133_v40 = vld [vmem:[%s1294_s1 + $0x3a0] sm:$0xff]  ;;  %v163_v41 = vld [vmem:[%s1294_s1 + $0x490] sm:$0xff] }
  0x45   :  { %697 = vmatpush3.msra.mxu1 %v127_v6  ;;  %523 = vmatpush1.msra.mxu0 %v150_v7  ;;  %v16_v42 = vld [vmem:[%s1293_s0 + $0x8] sm:$0x3]  ;;  %v117_v43 = vld [vmem:[%s1294_s1 + $0x320] sm:$0xff]  ;;  %v132_v44 = vld [vmem:[%s1294_s1 + $0x398] sm:$0xff] }
  0x46   :  { %698 = vmatprep.subr.mxu1 %v142_v8  ;;  %524 = vmatprep.subr.mxu0 %v753_v34  ;;  %v162_v45 = vld [vmem:[%s1294_s1 + $0x488] sm:$0xff]  ;;  %v116_v46 = vld [vmem:[%s1294_s1 + $0x318] sm:$0xff]  ;;  %v209_v47 = vrot.slane %v16_v42, %v176_v19  ;;  %v131_v48 = vld [vmem:[%s1294_s1 + $0x390] sm:$0xff]  ;;  %v205_v49 = vrot.slane %v16_v42, %v172_v55 }
  0x47   :  { %699 = vmatpush3.msra.mxu1 %v126_v9  ;;  %525 = vmatpush1.msra.mxu0 %v149_v11  ;;  %v115_v50 = vld [vmem:[%s1294_s1 + $0x310] sm:$0xff]  ;;  %v130_v19 = vld [vmem:[%s1294_s1 + $0x388] sm:$0xff]  ;;  %v129_v55 = vld [vmem:[%s1294_s1 + $0x380] sm:$0xff] }
  0x48   :  { %700 = vmatprep.subr.mxu1 %v141_v12  ;;  %526 = vmatprep.subr.mxu0 %v753_v34  ;;  %v114_v10 = vld [vmem:[%s1294_s1 + $0x308] sm:$0xff]  ;;  %v113_v51 = vld [vmem:[%s1294_s1 + $0x300] sm:$0xff] }
  0x49   :  { %701 = vmatpush3.msra.mxu1 %v125_v13  ;;  %527 = vmatpush1.msra.mxu0 %v148_v14  ;;  %v167_v58 = vld [vmem:[%s1295_s2] sm:$0x1] }
  0x4a   :  { %702 = vmatprep.subr.mxu1 %v140_v15  ;;  %528 = vmatprep.subr.mxu0 %v753_v34 }
  0x4b   :  { %703 = vmatpush3.msra.mxu1 %v124_v16  ;;  %529 = vmatpush1.msra.mxu0 %v147_v17 }
  0x4c   :  { %704 = vmatprep.subr.mxu1 %v139_v18  ;;  %530 = vmatprep.subr.mxu0 %v753_v34 }
  0x4d   :  { %705 = vmatpush3.msra.mxu1 %v123_v20  ;;  %531 = vmatpush1.msra.mxu0 %v146_v21 }
  0x4e   :  { %706 = vmatprep.subr.mxu1 %v138_v22  ;;  %532 = vmatprep.subr.mxu0 %v753_v34 }
  0x4f   :  { %707 = vmatpush3.msra.mxu1 %v122_v23  ;;  %533 = vmatpush1.msra.mxu0 %v145_v24 }
  0x50   :  { %708 = vmatprep.subr.mxu1 %v137_v25  ;;  %554 = vmatprep.subr.mxu0 %v753_v34 }
  0x51   :  { %709 = vmatpush3.msra.mxu1 %v121_v26  ;;  %555 = vmatpush2.msra.mxu0 %v166_v28 }
  0x52   :  { %710 = vmatprep.subr.mxu1 %v136_v29  ;;  %556 = vmatprep.subr.mxu0 %v753_v34 }
  0x53   :  { %711 = vmatpush3.msra.mxu1 %v120_v30  ;;  %557 = vmatpush2.msra.mxu0 %v165_v31 }
  0x54   :  { %712 = vmatprep.subr.mxu1 %v135_v32  ;;  %558 = vmatprep.subr.mxu0 %v753_v34 }
  0x55   :  { %713 = vmatpush3.msra.mxu1 %v119_v33  ;;  %559 = vmatpush2.msra.mxu0 %v164_v35 }
  0x56   :  { %714 = vmatprep.subr.mxu1 %v134_v37  ;;  %560 = vmatprep.subr.mxu0 %v753_v34 }
  0x57   :  { %715 = vmatpush3.msra.mxu1 %v118_v38  ;;  %496 = vmatprep.mubr.f32.mxu1 %v876_v36  ;;  %v161_v36 = vld [vmem:[%s1294_s1 + $0x480] sm:$0xff]  ;;  %s754_s1 = smov [#allocation2]  }
  0x58   :  { %716 = vmatprep.subr.mxu1 %v133_v40  ;;  %561 = vmatpush2.msra.mxu0 %v163_v41  ;;  %s580_s20 = sshll.u32 %s754_s1, 4  ;;  %s581_s20 = int_to_ptr.vmem [resolvable:$true] %s580_s20 }
  0x59   :  { %717 = vmatpush3.msra.mxu1 %v117_v43  ;;  %562 = vmatprep.subr.mxu0 %v753_v34  ;;  %s731_s21 = scalar_lea.vmem %s581_s20, 16  ;;  %s735_s2 = scalar_lea.vmem %s581_s20, 32 }
  0x5a   :  { %718 = vmatprep.subr.mxu1 %v132_v44  ;;  %563 = vmatpush2.msra.mxu0 %v162_v45  ;;  %p732_p0 = scmp.ne.s32.totalorder %s581_s20, %s731_s21  ;;  %p736_p1 = scmp.lt.s32.totalorder %s581_s20, %s581_s20 }
  0x5b   :  { %719 = vmatpush3.msra.mxu1 %v116_v46  ;;  %564 = vmatprep.subr.mxu0 %v753_v34  ;;  %p737_p2 = scmp.lt.s32.totalorder %s735_s2, %s731_s21 }
  0x5c   :  { %720 = vmatprep.subr.mxu1 %v131_v48  ;;  %565 = vmatpush2.msra.mxu0 %v161_v36 }
  0x5d   :  { %721 = vmatpush3.msra.mxu1 %v115_v50  ;;  %588 = vmatprep.mubr.msk.f32.mxu0 %vm219_vm0, %v209_v47  ;;  %p738_p3 = por %p737_p2, %p736_p1 }
  0x5e   :  { %722 = vmatprep.subr.mxu1 %v130_v19  ;;  %567 = vmatmul.mubr.f32.vlgmr.msra.gmra.mxu0 %v205_v49 }
  0x5f   :  { %723 = vmatpush3.msra.mxu1 %v114_v10  ;;  %p739_p4 = pnand %p738_p3, %p732_p0 }
  0x60   :  { %724 = vmatprep.subr.mxu1 %v129_v55 }
  0x61   :  { %725 = vmatpush3.msra.mxu1 %v113_v51 }
  0x62   :  { %497 = vmatmul.mubr.f32.vlgmr.msra.gmra.mxu1 %v885_v39 }
  0xe2   :  { %v621_v34 = vpop.f32.mrf.mxu1 }
  0xe4   :  { %v622_v52 = vpop.f32.mrf.mxu1 }
  0xe5   :  { %v623_v57 = vadd.f32 %v622_v52, %v621_v34 }
  0xe7   :  { %v289_v62 = vadd.f32 %v623_v57, %v167_v58 }
  0xea   :  { %v691_v54 = vpop.f32.mrf.mxu0 }
  0xec   :  { %v692_v59 = vpop.f32.mrf.mxu0 }
  0xed   :  { %v693_v2 = vadd.f32 %v692_v59, %v691_v54 }
 0x102   :  { %v656_v53 = vpop.f32.mrf.mxu1 }
 0x104   :  { %v657_v56 = vpop.f32.mrf.mxu1 }
 0x105   :  { %v658_v60 = vadd.f32 %v657_v56, %v656_v53 }
 0x107   :  { %v359_v0 = vadd.f32 %v658_v60, %v289_v62 }
 0x109   :  { %v429_v4 = vadd.f32 %v693_v2, %v359_v0 }
 0x11e   :  { %v568_v61 = vpop.f32.mrf.mxu0 }
 0x120   :  { %v570_v63 = vpop.f32.mrf.mxu0 }
 0x122   :  { %v726_v1 = vpop.f32.mrf.mxu1 }
 0x124   :  { %v727_v3 = vpop.f32.mrf.mxu1 }
 0x125   :  { %v728_v39 = vadd.f32 %v727_v3, %v726_v1 }
 0x127   :  { %v499_v5 = vadd.f32 %v728_v39, %v429_v4 }
 0x129   :  { %v569_v27 = vadd.f32 %v568_v61, %v499_v5 }
 0x12b   :  { %573 = vst.msk [vmem:[#allocation2] sm:$0x1] %vm572_vm1, %v569_v27 }
 0x12c   :  { %742 = shalt.err (!%p739_p4)
}
 0x12d   :  { %583 = dma.vmem_to_hbm [thread:$0]  %s581_s20, 16, %s1296_s3, [#allocation3]  }
 0x12e   :  { %751 = dma.done.wait [#allocation3], 16  }
 0x12f   :  { %752 = vsyncadd [#allocation3], 4294967280 }
 0x130   :  { %587 = vsyncpa [#allocation3], 1 }

</bundles_post_ra>
